<compile_context>
chip_gen: v7x
topology: tpu7x:2x2x1
jax: 0.10.0
libtpu: 0.0.40
codegen_flags: <defaults>
</compile_context>

<pallas_src>
import functools

import jax
import jax.numpy as jnp
from jax.experimental import pallas as pl
from jax.experimental.pallas import tpu as pltpu


def _cdiv(a, b):
    return -(-a // b)


def _sublanes(itemsize):
    # Minimum sublane granularity per dtype width (packed dtypes pack along sublanes).
    return {4: 8, 2: 16, 1: 32}.get(itemsize, 8)


def _vmem_capacity_bytes():
    try:
        return int(pltpu.get_tpu_info().vmem_capacity_bytes)
    except Exception:
        return 64 * 1024 * 1024  # conservative (v7x); v5e/v6e have 128 MiB


def _pick_tile_rows(H, W, itemsize, sub, vmem_bytes):
    """Row-tile size for the output grid (multiple of `sub`)."""
    # Double-buffered VMEM footprint per grid step:
    #   2 * (in (tm, W) + out (tm, W+2) + halo (sub, W)) * itemsize  <= vmem/2
    budget_words = (vmem_bytes // 2) // (2 * itemsize)
    tm = max(budget_words - sub * W, 0) // (2 * W + 2)
    # ~4 MiB of input per block already amortizes the ~0.35us/step overhead;
    # larger blocks only inflate the unrolled in-kernel chunk loop.
    tm = min(tm, max(sub, (4 * 1024 * 1024) // max(W * itemsize, 1)))
    tm = min(tm, 1024)
    # Keep >= ~4 roughly equal grid steps so both v7x TensorCores stay busy
    # (near-zero cost on single-TC v5e/v6e).
    tm = min(tm, _cdiv(H + 2, 4))
    tm = max(sub, (tm // sub) * sub)
    return tm


def _pick_chunk_rows(tm, W, itemsize, sub, max_vregs=32):
    """Rows per in-kernel sub-chunk so each load->roll->store chain stays in vregs."""
    lane_groups = _cdiv(W, 128)
    sc = (max_vregs // max(lane_groups, 1)) * sub
    sc = max(sub, sc)
    return min(sc, tm)


def _circular_pad_kernel(x_ref, halo_ref, o_ref, *, W, tm, sc, sub, bot_row, dense):
    """Writes one (tm, W+2) output row-block.

    x_ref:    (tm, W)   input rows [i*tm, i*tm + tm)        (index clamped at the end)
    halo_ref: (sub, W)  input rows [i*tm - sub, i*tm)       (clamped; local row sub-1 == i*tm - 1)
    o_ref:    (tm, W+2) output rows [i*tm, i*tm + tm)

    Output row r (global, 1 <= r <= H) holds the circularly W-padded input row
    r-1; global rows 0 and H+1 are zero.  Edge blocks may read garbage rows,
    but those only land in the zeroed border rows (overwritten below) or in
    out-of-range rows that Pallas masks on write-back of the partial block.
    """
    i = pl.program_id(0)

    def store_rows(dst, rows, src):
        # src: `rows` input rows; writes output rows [dst, dst+rows) of this block:
        #   out col 0      = src col W-1   (left wrap)
        #   out col 1..W   = src col 0..W-1
        #   out col W+1    = src col 0     (right wrap)
        if dense:
            # Lane-dense path (W >= 128): the roll places the left-wrap column at
            # lane 0 so the bulk store is at lane offset 0 (unmasked vst for every
            # full 128-lane group; only the final partial group is masked).
            o_ref[dst:dst + rows, 0:W] = pltpu.roll(src, shift=1, axis=1)
            o_ref[dst:dst + rows, W:W + 1] = src[:, W - 1:W]
        else:
            # Narrow W (< 128): every store is a masked partial store anyway;
            # skip the roll and store at lane offset 1.
            o_ref[dst:dst + rows, 1:W + 1] = src
            o_ref[dst:dst + rows, 0:1] = src[:, W - 1:W]
        o_ref[dst:dst + rows, W + 1:W + 2] = src[:, 0:1]

    # Output row 0 of this block <- input row i*tm - 1 (last halo row).  For
    # i == 0 this is garbage, but global row 0 is the zero border (overwritten).
    store_rows(0, 1, halo_ref[sub - 1:sub, :])

    # Output rows [1, tm) <- input local rows [0, tm-1), in small sub-chunks so
    # no full-tile intermediate is ever materialized (no concat, no big temps).
    # Chunks are dest-aligned: misalignment lands on the load side (3 vld slots)
    # rather than the store side (1-2 vst slots).
    r0 = min(sc, tm)
    if r0 > 1:
        store_rows(1, r0 - 1, x_ref[0:r0 - 1, :])
    for dst in range(sc, tm, sc):
        rows = min(sc, tm - dst)
        store_rows(dst, rows, x_ref[dst - 1:dst - 1 + rows, :])

    # Zero border rows.  These run AFTER the bulk stores (program order), so any
    # garbage written to global rows 0 / H+1 by the clamped edge blocks is
    # always overwritten.
    zero_row = jnp.zeros((1, W + 2), dtype=o_ref.dtype)

    @pl.when(i == 0)
    def _():
        o_ref[0:1, :] = zero_row  # global row 0

    @pl.when(i == pl.num_programs(0) - 1)
    def _():
        o_ref[bot_row:bot_row + 1, :] = zero_row  # global row H+1


def _pad2d_reference(x2d):
    x2d = jnp.pad(x2d, ((0, 0), (1, 1)), mode="wrap")
    return jnp.pad(x2d, ((1, 1), (0, 0)), mode="constant", constant_values=0)


def _reference(x):
    """Pure-JAX reference mirroring the PyTorch/numpy implementation."""
    H, W = x.shape[-2:]
    return _pad2d_reference(x.reshape(H, W)).reshape((1, 1, H + 2, W + 2))


def one_dim_circular_padding(x, *, xla_fallback_below_bytes=256 * 1024):
    """JAX/Pallas equivalent of OneDimCircularPadding(pad=((0,0),(1,1))).

    The last two axes are the (H, W) plane; all leading axes must be singletons
    (canonical NCHW (1, 1, H, W)).  Only the leading axes are squeezed, so
    H == 1 / W == 1 are never silently collapsed.

    Slabs smaller than `xla_fallback_below_bytes` (or with H below the dtype's
    sublane granularity) use XLA's fused pad: for the canonical 16x16 EMG slab
    the output is 18 lanes wide, every store is masked, and fixed pallas_call
    dispatch dominates, so XLA is strictly faster below ~256 KiB.
    """
    if x.ndim < 2:
        raise ValueError(f"expected input with at least 2 dims, got shape {x.shape}")
    lead, (H, W) = x.shape[:-2], x.shape[-2:]
    if any(d != 1 for d in lead):
        raise ValueError(f"leading dims must all be singleton, got shape {x.shape}")
    x2d = x.reshape(H, W)
    dtype = x2d.dtype
    itemsize = dtype.itemsize
    sub = _sublanes(itemsize)

    if H < sub or (H * W * itemsize) < xla_fallback_below_bytes:
        return _pad2d_reference(x2d).reshape((1, 1, H + 2, W + 2))

    vmem_phys = _vmem_capacity_bytes()
    tm = _pick_tile_rows(H, W, itemsize, sub, vmem_phys)
    sc = _pick_chunk_rows(tm, W, itemsize, sub)
    ng = _cdiv(H + 2, tm)
    hpb = tm // sub                       # halo (sub-row) blocks per row tile
    max_main = max((H - 1) // tm, 0)      # last valid (tm, W) input block
    max_halo = max((H - 1) // sub, 0)     # last valid (sub, W) input block
    bot_row = (H + 1) - (ng - 1) * tm     # local row of global row H+1 in the last block
    # Edge-block contract: the bottom zero row must land inside the last grid
    # step (rows past it are masked by Pallas on write-back of the partial block).
    assert 0 <= bot_row < tm, (H, tm, ng, bot_row)
    assert tm % sub == 0 and sc % sub == 0

    kernel = functools.partial(
        _circular_pad_kernel,
        W=W, tm=tm, sc=sc, sub=sub, bot_row=bot_row, dense=(W >= 128),
    )

    out2d = pl.pallas_call(
        kernel,
        out_shape=jax.ShapeDtypeStruct((H + 2, W + 2), dtype),
        grid=(ng,),
        in_specs=[
            # Bulk input rows for this output block (clamped for trailing edge blocks).
            pl.BlockSpec((tm, W), lambda i: (jnp.minimum(i, max_main), 0)),
            # sub-row halo whose last row is input row i*tm - 1 (bridges the +1
            # output-row offset without a sequential carry -> grid stays parallel).
            pl.BlockSpec((sub, W), lambda i: (jnp.clip(i * hpb - 1, 0, max_halo), 0)),
        ],
        out_specs=pl.BlockSpec((tm, W + 2), lambda i: (i, 0)),
        compiler_params=pltpu.CompilerParams(
            dimension_semantics=("parallel",),       # row tiles shard across v7x's 2 TCs
            vmem_limit_bytes=(vmem_phys * 3) // 4,   # generation-aware explicit limit
        ),
    )(x2d, x2d)

    return out2d.reshape((1, 1, H + 2, W + 2))


if __name__ == "__main__":
    key = jax.random.PRNGKey(0)
    k1, k2, k3, k4 = jax.random.split(key, 4)

    # 1) Canonical 16x16 EMG slab: (a) default tiny-slab XLA fallback,
    #    (b) forced Pallas path (narrow-W branch, 3-step row grid).
    x1 = jax.random.normal(k1, (1, 1, 16, 16), dtype=jnp.float32)
    ref1 = _reference(x1)
    out1a = jax.block_until_ready(one_dim_circular_padding(x1))
    out1b = jax.block_until_ready(
        one_dim_circular_padding(x1, xla_fallback_below_bytes=0))
    assert out1a.shape == (1, 1, 18, 18), out1a.shape
    assert out1b.shape == (1, 1, 18, 18), out1b.shape
    assert bool(jnp.array_equal(out1a, ref1)), "mismatch (16x16, XLA fallback)"
    assert bool(jnp.array_equal(out1b, ref1)), "mismatch (16x16, Pallas narrow-W)"

    # 2) Lane-dense f32 (W multiple of 128), multi-step row-tiled grid.
    x2 = jax.random.normal(k2, (1, 1, 512, 256), dtype=jnp.float32)
    out2 = jax.block_until_ready(one_dim_circular_padding(x2))
    assert out2.shape == (1, 1, 514, 258), out2.shape
    assert bool(jnp.array_equal(out2, _reference(x2))), "mismatch (512x256 f32)"

    # 3) W >= 128 but not a multiple of 128 (generalized roll + lane-0 store path).
    x3 = jax.random.normal(k3, (1, 1, 384, 192), dtype=jnp.float32)
    out3 = jax.block_until_ready(one_dim_circular_padding(x3))
    assert out3.shape == (1, 1, 386, 194), out3.shape
    assert bool(jnp.array_equal(out3, _reference(x3))), "mismatch (384x192 f32)"

    # 4) bf16 (packed dtype -> dtype-aware 16-row sublane granularity).
    x4 = jax.random.normal(k4, (1, 1, 512, 256), dtype=jnp.bfloat16)
    out4 = jax.block_until_ready(one_dim_circular_padding(x4))
    assert out4.shape == (1, 1, 514, 258), out4.shape
    assert bool(jnp.array_equal(out4, _reference(x4))), "mismatch (512x256 bf16)"

    print("KERNEL_OK")
</pallas_src>

<mosaic_0001>
module attributes {stable_mosaic.version = 11 : i64} {
  func.func @_circular_pad_kernel(%arg0: i32, %arg1: memref<8x16xf32, #tpu.memory_space<vmem>>, %arg2: memref<8x16xf32, #tpu.memory_space<vmem>>, %arg3: memref<8x18xf32, #tpu.memory_space<vmem>>) attributes {dimension_semantics = [#tpu.dimension_semantics<parallel>], iteration_bounds = array<i64: 3>, scalar_prefetch = 0 : i64, scratch_operands = 0 : i64, tpu.core_type = #tpu.core_type<tc>, window_params = [{transform_indices = @transform_0, window_bounds = array<i64: 8, 16>}, {transform_indices = @transform_1, window_bounds = array<i64: 8, 16>}, {transform_indices = @transform_2, window_bounds = array<i64: 8, 18>}]} {
    %c7 = arith.constant 7 : index
    %c0 = arith.constant 0 : index
    %0 = vector.load %arg2[%c7, %c0] : memref<8x16xf32, #tpu.memory_space<vmem>>, vector<1x16xf32>
    %c0_0 = arith.constant 0 : index
    %c1 = arith.constant 1 : index
    %1 = vector.load %arg3[%c0_0, %c1] : memref<8x18xf32, #tpu.memory_space<vmem>>, vector<1x16xf32>
    tpu.vector_store %arg3[%c0_0, %c1], %0 {strides = array<i32>} : memref<8x18xf32, #tpu.memory_space<vmem>>, vector<1x16xf32>,
    %2 = vector.extract_strided_slice %0 {offsets = [0, 15], sizes = [1, 1], strides = [1, 1]} : vector<1x16xf32> to vector<1x1xf32>
    %c0_1 = arith.constant 0 : index
    %c0_2 = arith.constant 0 : index
    %3 = vector.load %arg3[%c0_1, %c0_2] : memref<8x18xf32, #tpu.memory_space<vmem>>, vector<1x1xf32>
    tpu.vector_store %arg3[%c0_1, %c0_2], %2 {strides = array<i32>} : memref<8x18xf32, #tpu.memory_space<vmem>>, vector<1x1xf32>,
    %4 = vector.extract_strided_slice %0 {offsets = [0, 0], sizes = [1, 1], strides = [1, 1]} : vector<1x16xf32> to vector<1x1xf32>
    %c0_3 = arith.constant 0 : index
    %c17 = arith.constant 17 : index
    %5 = vector.load %arg3[%c0_3, %c17] : memref<8x18xf32, #tpu.memory_space<vmem>>, vector<1x1xf32>
    tpu.vector_store %arg3[%c0_3, %c17], %4 {strides = array<i32>} : memref<8x18xf32, #tpu.memory_space<vmem>>, vector<1x1xf32>,
    %c0_4 = arith.constant 0 : index
    %c0_5 = arith.constant 0 : index
    %6 = vector.load %arg1[%c0_4, %c0_5] : memref<8x16xf32, #tpu.memory_space<vmem>>, vector<7x16xf32>
    %c1_6 = arith.constant 1 : index
    %c1_7 = arith.constant 1 : index
    %7 = vector.load %arg3[%c1_6, %c1_7] : memref<8x18xf32, #tpu.memory_space<vmem>>, vector<7x16xf32>
    tpu.vector_store %arg3[%c1_6, %c1_7], %6 {strides = array<i32>} : memref<8x18xf32, #tpu.memory_space<vmem>>, vector<7x16xf32>,
    %8 = vector.extract_strided_slice %6 {offsets = [0, 15], sizes = [7, 1], strides = [1, 1]} : vector<7x16xf32> to vector<7x1xf32>
    %c1_8 = arith.constant 1 : index
    %c0_9 = arith.constant 0 : index
    %9 = vector.load %arg3[%c1_8, %c0_9] : memref<8x18xf32, #tpu.memory_space<vmem>>, vector<7x1xf32>
    tpu.vector_store %arg3[%c1_8, %c0_9], %8 {strides = array<i32>} : memref<8x18xf32, #tpu.memory_space<vmem>>, vector<7x1xf32>,
    %10 = vector.extract_strided_slice %6 {offsets = [0, 0], sizes = [7, 1], strides = [1, 1]} : vector<7x16xf32> to vector<7x1xf32>
    %c1_10 = arith.constant 1 : index
    %c17_11 = arith.constant 17 : index
    %11 = vector.load %arg3[%c1_10, %c17_11] : memref<8x18xf32, #tpu.memory_space<vmem>>, vector<7x1xf32>
    tpu.vector_store %arg3[%c1_10, %c17_11], %10 {strides = array<i32>} : memref<8x18xf32, #tpu.memory_space<vmem>>, vector<7x1xf32>,
    %cst = arith.constant 0.000000e+00 : f32
    %12 = vector.broadcast %cst : f32 to vector<1x18xf32>
    %c0_i32 = arith.constant 0 : i32
    %13 = arith.cmpi eq, %arg0, %c0_i32 : i32
    %14 = arith.extui %13 : i1 to i32
    %c0_i32_12 = arith.constant 0 : i32
    %15 = arith.cmpi ne, %14, %c0_i32_12 : i32
    scf.if %15 {
      %c0_14 = arith.constant 0 : index
      %c0_15 = arith.constant 0 : index
      %19 = vector.load %arg3[%c0_14, %c0_15] : memref<8x18xf32, #tpu.memory_space<vmem>>, vector<1x18xf32>
      tpu.vector_store %arg3[%c0_14, %c0_15], %12 {strides = array<i32>} : memref<8x18xf32, #tpu.memory_space<vmem>>, vector<1x18xf32>,
    } else {
    }
    %c2_i32 = arith.constant 2 : i32
    %16 = arith.cmpi eq, %arg0, %c2_i32 : i32
    %17 = arith.extui %16 : i1 to i32
    %c0_i32_13 = arith.constant 0 : i32
    %18 = arith.cmpi ne, %17, %c0_i32_13 : i32
    scf.if %18 {
      %c1_14 = arith.constant 1 : index
      %c0_15 = arith.constant 0 : index
      %19 = vector.load %arg3[%c1_14, %c0_15] : memref<8x18xf32, #tpu.memory_space<vmem>>, vector<1x18xf32>
      tpu.vector_store %arg3[%c1_14, %c0_15], %12 {strides = array<i32>} : memref<8x18xf32, #tpu.memory_space<vmem>>, vector<1x18xf32>,
    } else {
    }
    return
  }
  func.func @transform_0(%arg0: i32) -> (i32, i32) {
    %c1_i32 = arith.constant 1 : i32
    %0 = arith.minsi %arg0, %c1_i32 : i32
    %c0_i32 = arith.constant 0 : i32
    %c0_i32_0 = arith.constant 0 : i32
    return %0, %c0_i32 : i32, i32
  }
  func.func @transform_1(%arg0: i32) -> (i32, i32) {
    %c1_i32 = arith.constant 1 : i32
    %0 = arith.muli %arg0, %c1_i32 : i32
    %c1_i32_0 = arith.constant 1 : i32
    %1 = arith.subi %0, %c1_i32_0 : i32
    %c0_i32 = arith.constant 0 : i32
    %c1_i32_1 = arith.constant 1 : i32
    %2 = arith.maxsi %c0_i32, %1 : i32
    %3 = arith.minsi %c1_i32_1, %2 : i32
    %c0_i32_2 = arith.constant 0 : i32
    %c0_i32_3 = arith.constant 0 : i32
    return %3, %c0_i32_2 : i32, i32
  }
  func.func @transform_2(%arg0: i32) -> (i32, i32) {
    %c0_i32 = arith.constant 0 : i32
    %c0_i32_0 = arith.constant 0 : i32
    return %arg0, %c0_i32 : i32, i32
  }
}

</mosaic_0001>

<bundles_post_ra>
// kernel: tpu_custom_call.1
= control target key start
LH: loop header
LB: loop body
LE: loop exit
PB: predicated region body
PF: predicated region fallthrough
CT: control target
= control target key end

     0   :  { %s1035_s0 = inlined_call_operand.hbm [shape: f32[16,16], index: 0, kind: input, shape index: {}]   ;;  %s1036_s1 = inlined_call_operand.hbm [shape: f32[16,16], index: 1, kind: input, shape index: {}]   ;;  %s1037_s2 = inlined_call_operand.hbm [shape: f32[18,18], index: 2, kind: output, shape index: {}]  }
   0x1   :  { %1043 = sst [smem:[#allocation11_spill]] %s1035_s0 }
   0x2   :  { %7 = vsyncpa [#allocation3], 0 }
   0x3   :  { %9 = vsyncpa [#allocation3 + $0x1], 0 }
   0x4   :  { %10 = vsyncpa [#allocation6], 0 }
   0x5   :  { %12 = vsyncpa [#allocation6 + $0x1], 0 }
   0x6   :  { %13 = vsyncpa [#allocation4], 0 }
   0x7   :  { %15 = vsyncpa [#allocation4 + $0x1], 0  ;;  %s725_s9 = smov 0   ;;  %s727_s10 = smov 0  }
   0x8   :  { %s729_s11 = smov 0   ;;  %s731_s12 = smov 0  }
   0x9   :  { %s733_s13 = smov 0   ;;  %s735_s14 = smov 0  }
   0xa   :  { %s737_s15 = smov 0   ;;  %s739_s16 = smov 0  }
   0xb   :  { %s741_s17 = smov 0   ;;  %s743_s18 = smov 0  }
   0xc LB: > { %s776_s19 = sadd.s32 1, %s700_s18   ;;  %p25_p0 = scmp.lt.s32.totalorder %s700_s18, 1  ;;  %s700_s18 = sphi %s743_s18, %s1072_s18   ;;  %s696_s17 = sphi %s741_s17, %s1071_s17   ;;  %s692_s16 = sphi %s739_s16, %s1070_s16   ;;  %s688_s15 = sphi %s737_s15, %s1069_s15   ;;  %s684_s14 = sphi %s735_s14, %s1068_s14   ;;  %s680_s13 = sphi %s733_s13, %s1067_s13   ;;  %s676_s12 = sphi %s731_s12, %s1066_s12   ;;  %s672_s11 = sphi %s729_s11, %s1065_s11   ;;  %s668_s10 = sphi %s727_s10, %s1064_s10   ;;  %s664_s9 = sphi %s725_s9, %s1063_s9  }
   0xd   : > { %p27_p1 = scmp.lt.s32.totalorder %s776_s19, 1  ;;  %s32_s20 = sadd.s32 1, %s696_s17 }
   0xe   : > { %s26_s21 = scalar_select %p25_p0, %s700_s18, 1 }
   0xf   : > { %s28_s22 = scalar_select %p27_p1, %s776_s19, 1 }
  0x10   : > { %p39_p2 = scmp.ne.s32.totalorder %s696_s17, %s692_s16  ;;  %p1039_p3 = scmp.eq.s32.totalorder %s700_s18, 0 }
  0x11   : > { %s29_s23 = ssub.s32 %s26_s21, %s28_s22  ;;  %s91_s25 = ssub.s32 %s700_s18, %s776_s19 }
  0x12   : > { %p30_p5 = scmp.eq.s32.totalorder %s29_s23, 0  ;;  %p790_p6 = por %p1039_p3, %p39_p2 }
  0x13   : > { %s94_s26 = sadd.s32 1, %s672_s11  ;;  %p92_p7 = scmp.eq.s32.totalorder %s91_s25, 0 }
  0x14   : > { %s798_s27 = scalar_select %p30_p5, %s696_s17, %s32_s20  }
  0x15   : > { %p1038_p8 = scmp.lt.s32.totalorder %s700_s18, 3  ;;  %s131_s28 = sand.u32 1, %s696_s17  }
  0x16   : > { %s803_s29 = scalar_select %p92_p7, %s672_s11, %s94_s26  }
  0x17   : > { %s392_s30 = sshll.u32 %s131_s28, 3  ;;  %s393_s3 = sshll.u32 %s26_s21, 7 }
  0x18   : > { %s1045_s0 = sld [smem:[#allocation11_spill]]  ;;  %s135_s7 = scalar_lea.vmem [#allocation2], %s392_s30 }
  0x19   : > { %s144_s8 = sshll.u32 %s135_s7, 4  ;;  %p816_p9 = pnand %p1038_p8, %p790_p6  ;;  %s810_s8 = int_to_ptr.vmem [resolvable:$true] %s144_s8 }
  0x1a   : > { %p172_p11 = scmp.lt.s32.totalorder %s700_s18, 4  ;;  %s132_s21 = scalar_lea.sflag [#allocation3], %s131_s28 }
  0x1b   : > { %p524_p13 = pneg %p816_p9 }
  0x1e   : > { %s808_s6 = scalar_lea.hbm %s1045_s0, %s393_s3  ;;  %s527_s25 = scalar_lea.hbm %s1045_s0, 256 }
  0x1f   : > { %s522_s22 = scalar_lea.hbm %s808_s6, 128  ;;  %p528_p2 = scmp.lt.u32.totalorder %s808_s6, %s1045_s0 }
  0x20   : > { %p523_p12 = scmp.ne.s32.totalorder %s808_s6, %s522_s22  ;;  %p529_p5 = scmp.lt.u32.totalorder %s527_s25, %s522_s22 }
  0x21   : > { %p531_p7 = scmp.lt.u32.totalorder %s522_s22, %s808_s6 }
  0x22   : > { %p525_p0 = pnand %p524_p13, %p523_p12  ;;  %p530_p6 = por %p529_p5, %p528_p2 }
  0x24   : > { %p526_p1 = pneg %p525_p0  ;;  %p532_p8 = por %p531_p7, %p530_p6 }
  0x26   : > { %p533_p3 = pnand %p532_p8, %p526_p1 }
  0x28   : > { %536 = shalt.err (!%p533_p3)
}
  0x29   : > { %s537_s28 = scalar_lea.vmem %s810_s8, 128  ;;  %s702_s3 = smov [#allocation2]  }
  0x2a   : > { %p538_p12 = scmp.ne.s32.totalorder %s810_s8, %s537_s28  ;;  %s542_s4 = sshll.u32 %s702_s3, 4  ;;  %s543_s4 = int_to_ptr.vmem [resolvable:$false] %s542_s4 }
  0x2b   : > { %s544_s5 = scalar_lea.vmem %s543_s4, 256  ;;  %p545_p10 = scmp.lt.s32.totalorder %s810_s8, %s543_s4 }
  0x2c   : > { %p540_p0 = pnand %p538_p12, %p524_p13  ;;  %p546_p2 = scmp.lt.s32.totalorder %s544_s5, %s537_s28 }
  0x2e   : > { %p541_p4 = pneg %p540_p0  ;;  %p547_p5 = por %p546_p2, %p545_p10 }
  0x30   : > { %p548_p6 = pnand %p547_p5, %p541_p4 }
  0x32   : > { %551 = shalt.err (!%p548_p6)
}
  0x33   : > { %427 = dma.hbm_to_vmem [thread:$0]  (!%p816_p9), %s808_s6, 128, %s810_s8, %s132_s21  }
  0x34   : > { %p1047_p3 = scmp.ge.s32.totalorder %s700_s18, 1  ;;  %s856_s20 = sadd.s32 4294967295, %s700_s18  }
  0x35   : > { %s377_s22 = sadd.s32 4294967294, %s700_s18   ;;  %p46_p8 = scmp.eq.s32.totalorder %s856_s20, 0 }
  0x36   : > { %p851_p4 = pnand %p1047_p3, %p172_p11  ;;  %p56_p9 = scmp.gt.s32.totalorder %s856_s20, 0 }
  0x37   : > { %p379_p10 = scmp.lt.s32.totalorder %s856_s20, 1  ;;  %s384_s6 = sadd.s32 4294967295, %s776_s19 }
  0x38   : > { %p1049_p11 = scmp.ne.s32.totalorder %s692_s16, %s688_s15  ;;  %p61_p1 = scmp.gt.s32.totalorder %s384_s6, 0 }
  0x39   : > { %s57_s21 = scalar_select %p56_p9, %s856_s20, 0 }
  0x3a   : > { %p868_p13 = por %p46_p8, %p1049_p11  ;;  %p385_p7 = scmp.lt.s32.totalorder %s384_s6, 1 }
  0x3b   : > { %s62_s23 = scalar_select %p61_p1, %s384_s6, 0 }
  0x3c   : > { %s1050_s8 = scalar_select %p868_p13, 1, 0 }
  0x3d   : > { %s1074_s21 = smov (!%p379_p10, %s57_s21), 1  ;;  %s68_s24 = sadd.s32 1, %s684_s14 }
  0x3e   : > { %p75_p12 = scmp.ne.s32.totalorder %s684_s14, %s680_s13  ;;  %p81_p0 = scmp.ne.s32.totalorder %s680_s13, %s676_s12 }
  0x3f   : > { %s1076_s23 = smov (!%p385_p7, %s62_s23), 1  ;;  %p1051_p2 = scmp.eq.s32.totalorder %s700_s18, 0 }
  0x40   : > { %p886_p6 = por %p81_p0, %p46_p8  ;;  %s65_s26 = ssub.s32 %s1074_s21, %s1076_s23 }
  0x41   : > { %p880_p5 = por %p75_p12, %p1051_p2  ;;  %p104_p3 = scmp.ne.s32.totalorder %s672_s11, %s668_s10 }
  0x42   : > { %s1053_s25 = scalar_select %p886_p6, 1, 0 }
  0x43   : > { %p66_p9 = scmp.eq.s32.totalorder %s65_s26, 0  ;;  %p105_p10 = scmp.eq.s32.totalorder %s856_s20, 2 }
  0x44   : > { %p110_p11 = scmp.ne.s32.totalorder %s668_s10, %s664_s9  ;;  %p111_p1 = scmp.eq.s32.totalorder %s377_s22, 2 }
  0x45   : > { %s896_s12 = scalar_select %p66_p9, %s684_s14, %s68_s24  }
  0x46   : > { %p898_p7 = por %p105_p10, %p104_p3  ;;  %p902_p12 = por %p111_p1, %p110_p11 }
  0x47   : > { %s151_s3 = sand.u32 1, %s684_s14   ;;  %s401_s4 = sshll.u32 %s1074_s21, 7 }
  0x48   : > { %s1054_s30 = scalar_select %p898_p7, 1, 0 }
  0x49   : > { %s1055_s28 = scalar_select %p902_p12, 1, 0 }
  0x4a   : > { %s394_s5 = sshll.u32 %s151_s3, 3  ;;  %s910_s26 = scalar_lea.hbm %s1036_s1, %s401_s4 }
  0x4b   : > { %s155_s22 = scalar_lea.vmem [#allocation5], %s394_s5  ;;  %p1056_p8 = scmp.lt.s32.totalorder %s700_s18, 3 }
  0x4c   : > { %s167_s24 = sshll.u32 %s155_s22, 4  ;;  %s152_s21 = scalar_lea.sflag [#allocation6], %s151_s3  ;;  %s920_s24 = int_to_ptr.vmem [resolvable:$true] %s167_s24 }
  0x4d   : > { %p916_p0 = pnand %p1056_p8, %p880_p5  ;;  %s552_s6 = scalar_lea.hbm %s910_s26, 128 }
  0x4e   : > { %p553_p2 = scmp.ne.s32.totalorder %s910_s26, %s552_s6  ;;  %s557_s5 = scalar_lea.hbm %s1036_s1, 256 }
  0x4f   : > { %p554_p3 = pneg %p916_p0  ;;  %p558_p5 = scmp.lt.u32.totalorder %s910_s26, %s1036_s1 }
  0x50   : > { %p559_p11 = scmp.lt.u32.totalorder %s557_s5, %s552_s6  ;;  %p561_p8 = scmp.lt.u32.totalorder %s552_s6, %s910_s26 }
  0x51   : > { %p555_p9 = pnand %p554_p3, %p553_p2 }
  0x52   : > { %p560_p1 = por %p559_p11, %p558_p5 }
  0x53   : > { %p556_p10 = pneg %p555_p9 }
  0x54   : > { %p562_p12 = por %p561_p8, %p560_p1 }
  0x56   : > { %p563_p7 = pnand %p562_p12, %p556_p10 }
  0x58   : > { %566 = shalt.err (!%p563_p7)
}
  0x59   : > { %s567_s3 = scalar_lea.vmem %s920_s24, 128  ;;  %s703_s4 = smov [#allocation5]  }
  0x5a   : > { %p568_p2 = scmp.ne.s32.totalorder %s920_s24, %s567_s3  ;;  %s572_s15 = sshll.u32 %s703_s4, 4  ;;  %s573_s15 = int_to_ptr.vmem [resolvable:$false] %s572_s15 }
  0x5b   : > { %s574_s23 = scalar_lea.vmem %s573_s15, 256  ;;  %p575_p13 = scmp.lt.s32.totalorder %s920_s24, %s573_s15 }
  0x5c   : > { %p570_p9 = pnand %p568_p2, %p554_p3  ;;  %p576_p5 = scmp.lt.s32.totalorder %s574_s23, %s567_s3 }
  0x5e   : > { %p571_p6 = pneg %p570_p9  ;;  %p577_p11 = por %p576_p5, %p575_p13 }
  0x60   : > { %p578_p1 = pnand %p577_p11, %p571_p6 }
  0x62   : > { %581 = shalt.err (!%p578_p1)
}
  0x63   : > { %430 = dma.hbm_to_vmem [thread:$0]  (!%p916_p0), %s910_s26, 128, %s920_s24, %s152_s21  }
  0x64   : > { %176 = sbr.rel (%p851_p4) target bundleno = 273 (0x111), region = 28  ;;  %s178_s6 = sand.u32 (!%p851_p4), 1, %s692_s16  }
  0x65   : > { %s403_s5 = sshll.u32 (!%p851_p4), %s178_s6, 3  ;;  %s179_s22 = scalar_lea.sflag (!%p851_p4), [#allocation3], %s178_s6 }
  0x66   : > { %s182_s4 = scalar_lea.vmem (!%p851_p4), [#allocation2], %s403_s5  ;;  %p1058_p7 = scmp.ne.s32.totalorder (!%p851_p4), %s1050_s8, 0 }
  0x6b   : > { %651 = dma.done.wait (%p1058_p7), %s179_s22, 128  }
  0x6c   : > { %653 = vsyncadd (%p1058_p7), %s179_s22, 4294967168  ;;  %s187_s0 = sand.u32 1, %s680_s13   ;;  %p1059_p13 = scmp.ne.s32.totalorder %s1053_s25, 0 }
  0x6d   : > { %s404_s3 = sshll.u32 %s187_s0, 3  ;;  %s188_s15 = scalar_lea.sflag [#allocation6], %s187_s0 }
  0x6e   : > { %s191_s26 = scalar_lea.vmem [#allocation5], %s404_s3 }
  0x6f   : > { %655 = dma.done.wait (%p1059_p13), %s188_s15, 128  }
  0x70   : > { %657 = vsyncadd (%p1059_p13), %s188_s15, 4294967168  ;;  %v224_v0 = vld [vmem:[%s191_s26 + $0x7] sm:$0x1]  ;;  %s704_s7 = smov 113   ;;  %s705_s24 = smov 1   ;;  %vm229_vm0 = vcmask 131080  }
  0x71   : > { %231 = vrot.lane.b32.xlu1 %v224_v0, %s704_s7  ;;  %226 = vrot.lane.b32.xlu0 %v224_v0, %s705_s24  ;;  %v241_v1 = vld [vmem:[%s182_s4] sm:$0x7f]  ;;  %s706_s8 = smov 17   ;;  %s214_s21 = sand.u32 1, %s668_s10   ;;  %vm234_vm1 = vcmask 0   ;;  %vm246_vm2 = vcmask 137224  }
  0x72   : > { %s405_s23 = sshll.u32 %s214_s21, 3  ;;  %vm251_vm3 = vcmask 6144   ;;  %vm256_vm4 = vcmask 145544   ;;  %vm239_vm5 = vcmask 139400   ;;  %p406_p4 = scmp.ne.s32.totalorder %s856_s20, 0 }
  0x73   : > { %s962_s25 = scalar_lea.vmem [#allocation7], %s405_s23  ;;  %vm262_vm6 = vcmask (!%p406_p4), 139264   ;;  %v707_v8 = vmov (!%p406_p4), 0.0  }
  0x75   : > { %248 = vrot.lane.b32.xlu1 %v241_v1, %s704_s7  ;;  %243 = vrot.lane.b32.xlu0 %v241_v1, %s705_s24 }
  0x79   : > { %253 = vrot.lane.b32.xlu1 %v241_v1, %s706_s8  ;;  %236 = vrot.lane.b32.xlu0 %v224_v0, %s706_s8 }
  0xe3   : > { %v232_v2 = vpop.permute.xlu1 %231  ;;  %v227_v3 = vpop.permute.xlu0 %226 }
  0xe4   : > { %230 = vst.msk [vmem:[%s962_s25] sm:$0x1] %vm229_vm0, %v227_v3 }
  0xe5   : > { %235 = vst.msk [vmem:[%s962_s25] sm:$0x1] %vm234_vm1, %v232_v2 }
  0xe7   : > { %v249_v4 = vpop.permute.xlu1 %248  ;;  %v244_v5 = vpop.permute.xlu0 %243  ;;  %261 = sbr.rel (%p406_p4) target bundleno = 239 (0xef), region = 40 }
  0xe8   : > { %247 = vst.msk [vmem:[%s962_s25 + $0x1] sm:$0x7f] %vm246_vm2, %v244_v5 }
  0xe9   : > { %252 = vst.msk [vmem:[%s962_s25 + $0x1] sm:$0x7f] %vm251_vm3, %v249_v4 }
  0xeb   : > { %v254_v6 = vpop.permute.xlu1 %253  ;;  %v237_v7 = vpop.permute.xlu0 %236 }
  0xec   : > { %257 = vst.msk [vmem:[%s962_s25 + $0x1] sm:$0x7f] %vm256_vm4, %v254_v6 }
  0xed   : > { %240 = vst.msk [vmem:[%s962_s25] sm:$0x1] %vm239_vm5, %v237_v7 }
  0xee   : > { %263 = vst.msk [vmem:[%s962_s25] sm:$0x1] %vm262_vm6, %v707_v8 }
  0xef PF: > { %p407_p6 = scmp.ne.s32.totalorder %s856_s20, 2 }
  0xf0   : > { %vm268_vm7 = vcmask (!%p407_p6), 139264   ;;  %v708_v9 = vmov (!%p407_p6), 0.0  }
  0xf1   : > { %267 = sbr.rel (%p407_p6) target bundleno = 248 (0xf8), region = 44  ;;  %269 = vst.msk [vmem:[%s962_s25 + $0x1] sm:$0x1] (!%p407_p6), %vm268_vm7, %v708_v9 }
  0xf8 PF: > { %s409_s6 = sshll.u32 %s856_s20, 7  ;;  %s284_s0 = sshll.u32 %s962_s25, 4  ;;  %s285_s0 = int_to_ptr.vmem [resolvable:$true] %s284_s0 }
  0xf9   : > { %s978_s4 = scalar_lea.hbm %s1037_s2, %s409_s6  ;;  %s271_s3 = scalar_lea.sflag [#allocation4], %s214_s21 }
  0xfa   : > { %s582_s15 = scalar_lea.vmem %s285_s0, 128  ;;  %p1060_p0 = scmp.ne.s32.totalorder %s1054_s30, 0 }
  0xfb   : > { %p583_p12 = scmp.ne.s32.totalorder %s285_s0, %s582_s15  ;;  %s709_s26 = smov [#allocation7]  }
  0xfc   : > { %s586_s7 = sshll.u32 %s709_s26, 4  ;;  %s587_s7 = int_to_ptr.vmem [resolvable:$false] %s586_s7 }
  0xfd   : > { %p584_p3 = pnand %p583_p12, %p1060_p0  ;;  %s588_s24 = scalar_lea.vmem %s587_s7, 256 }
  0xfe   : > { %p589_p8 = scmp.lt.s32.totalorder %s285_s0, %s587_s7  ;;  %p590_p2 = scmp.lt.s32.totalorder %s588_s24, %s582_s15 }
  0xff   : > { %p585_p10 = pneg %p584_p3 }
 0x100   : > { %p591_p9 = por %p590_p2, %p589_p8 }
 0x102   : > { %p592_p5 = pnand %p591_p9, %p585_p10 }
 0x104   : > { %595 = shalt.err (!%p592_p5)
}
 0x105   : > { %s596_s20 = scalar_lea.hbm %s978_s4, 128  ;;  %s600_s23 = scalar_lea.hbm %s1037_s2, 384 }
 0x106   : > { %p597_p11 = scmp.ne.s32.totalorder %s978_s4, %s596_s20  ;;  %p601_p13 = scmp.lt.u32.totalorder %s978_s4, %s1037_s2 }
 0x107   : > { %p602_p4 = scmp.lt.u32.totalorder %s600_s23, %s596_s20  ;;  %p604_p12 = scmp.lt.u32.totalorder %s596_s20, %s978_s4 }
 0x108   : > { %p598_p1 = pnand %p597_p11, %p1060_p0 }
 0x109   : > { %p603_p6 = por %p602_p4, %p601_p13 }
 0x10a   : > { %p599_p7 = pneg %p598_p1 }
 0x10b   : > { %p605_p3 = por %p604_p12, %p603_p6 }
 0x10d   : > { %p606_p10 = pnand %p605_p3, %p599_p7 }
 0x10f   : > { %609 = shalt.err (!%p606_p10)
}
 0x110   : > { %422 = dma.vmem_to_hbm [thread:$0]  (%p1060_p0), %s285_s0, 128, %s978_s4, %s271_s3  }
 0x111 PF: > { %p436_p8 = scmp.ge.s32.totalorder %s700_s18, 2  ;;  %s296_s5 = sand.u32 1, %s664_s9  }
 0x112   : > { %p1061_p2 = scmp.ne.s32.totalorder %s1055_s28, 0  ;;  %s297_s22 = scalar_lea.sflag [#allocation4], %s296_s5 }
 0x114   : > { %p432_p9 = pnand %p436_p8, %p1061_p2 }
 0x116   : > { %659 = dma.done.wait (!%p432_p9), %s297_s22, 128  }
 0x117   : > { %661 = vsyncadd (!%p432_p9), %s297_s22, 4294967168  ;;  %s1062_s30 = smov %s896_s12  ;;  %p18_p0 = scmp.ge.s32.totalorder %s776_s19, 5  }
 0x118   : > { %s1063_s9 = smov %s668_s10  ;;  %s1064_s10 = smov %s672_s11 }
 0x119   : > { %s1065_s11 = smov %s803_s29  ;;  %s1066_s12 = smov %s680_s13 }
 0x11a   : > { %s1067_s13 = smov %s684_s14  ;;  %s1068_s14 = smov %s1062_s30 }
 0x11b   : > { %s1069_s15 = smov %s692_s16  ;;  %s1070_s16 = smov %s696_s17 }
 0x11c   : > { %s1071_s17 = smov %s798_s27  ;;  %s1072_s18 = smov %s776_s19 }
 0x11d   :  { %20 = sbr.rel (!%p18_p0) target bundleno = 12 (0xc), region = 94 }
 0x124   :  { %302 = vsyncpa [#allocation3], 1 }
 0x125   :  { %304 = vsyncpa [#allocation3 + $0x1], 1 }
 0x126   :  { %305 = vsyncpa [#allocation6], 1 }
 0x127   :  { %307 = vsyncpa [#allocation6 + $0x1], 1 }
 0x128   :  { %308 = vsyncpa [#allocation4], 1 }
 0x129   :  { %310 = vsyncpa [#allocation4 + $0x1], 1 }

</bundles_post_ra>
